<compile_context>
chip_gen: v6e
topology: v6e:2x2x1
jax: 0.10.0
libtpu: 0.0.40
codegen_flags: <defaults>
</compile_context>

<pallas_src>
import jax
import jax.numpy as jnp
from jax.experimental import pallas as pl
from jax.experimental.pallas import tpu as pltpu


def _round_up(a, b):
    return ((a + b - 1) // b) * b


def _vmem_budget_bytes():
    """Per-generation VMEM budget with headroom for compiler scratch/spills."""
    try:
        cap = int(pltpu.get_tpu_info().vmem_capacity_bytes)
    except Exception:
        cap = 64 * 1024 * 1024  # conservative (v7x-sized) if the query is unavailable
    return (cap * 3) // 4       # ~48 MiB on v7x, ~96 MiB on v5e/v6e


def _largest_aligned_divisor(n, align, cap):
    """Largest d <= cap with d % align == 0 and n % d == 0, else 0."""
    d = (min(cap, n) // align) * align
    while d >= align:
        if n % d == 0:
            return d
        d -= align
    return 0


def _choose_tm(M, cap, sub):
    """Rows per M tile: prefer MXU-aligned divisors of M (no padding needed)."""
    cap = max(sub, cap)
    if M <= cap:
        # One tile covers all rows.  For larger M split in two so the 'parallel'
        # M axis can be sharded across both TensorCores (v7x megacore); on 1-TC
        # chips this is just one extra (~0.35us) grid step.
        if M >= 512 and M % (2 * sub) == 0:
            return M // 2
        return M
    for align in (256, 128, sub):
        tm = _largest_aligned_divisor(M, align, cap)
        if tm:
            return tm
    # No aligned divisor of M: use an aligned tile and pad the ragged last tile.
    return max(sub, (cap // sub) * sub)


# ---------------------------------------------------------------------------
# Kernels
# ---------------------------------------------------------------------------
def _ffn_fused_kernel(x_ref, w1_ref, b1_ref, w2_ref, b2_ref, o_ref):
    """Fast path: whole hidden dim resident.  fc1 -> ReLU -> (dropout=id) -> fc2."""
    x = x_ref[...].astype(w1_ref.dtype)          # in-kernel cast (VPU), no extra HBM pass
    h = jnp.dot(x, w1_ref[...], preferred_element_type=jnp.float32)
    h = jnp.maximum(h + b1_ref[...], 0.0)        # fc1 bias + ReLU in f32
    # dropout -> identity (inference).
    y = jnp.dot(h.astype(w2_ref.dtype), w2_ref[...],
                preferred_element_type=jnp.float32)
    o_ref[...] = (y + b2_ref[...]).astype(o_ref.dtype)


def _ffn_ksplit_kernel(x_ref, w1_ref, b1_ref, w2_ref, b2_ref, o_ref, acc_ref):
    """Hidden dim split over grid axis 1 with an f32 on-chip accumulator."""
    k = pl.program_id(1)

    @pl.when(k == 0)
    def _():
        acc_ref[...] = jnp.zeros_like(acc_ref)

    x = x_ref[...].astype(w1_ref.dtype)
    h = jnp.dot(x, w1_ref[...], preferred_element_type=jnp.float32)
    h = jnp.maximum(h + b1_ref[...], 0.0)
    acc_ref[...] += jnp.dot(h.astype(w2_ref.dtype), w2_ref[...],
                            preferred_element_type=jnp.float32)

    @pl.when(k == pl.num_programs(1) - 1)
    def _():
        o_ref[...] = (acc_ref[...] + b2_ref[...]).astype(o_ref.dtype)


# ---------------------------------------------------------------------------
# Wrapper
# ---------------------------------------------------------------------------
def positionwise_forward(x, w1, b1, w2, b2, *, block_m=512, block_k=None,
                         compute_dtype=None):
    """Transformer position-wise FFN: relu(x @ w1 + b1) @ w2 + b2.

    x:  (B, S, d_model)
    w1: (d_model, hidden), b1: (hidden,)   (transpose of torch fc1.weight)
    w2: (hidden, d_model), b2: (d_model,)  (transpose of torch fc2.weight)
    compute_dtype: optional MXU operand dtype (e.g. jnp.bfloat16) for full-rate
        MXU; the reduction always accumulates in f32.
    block_k: optional hidden-dim tile (multiple of 128 dividing hidden) to force
        the k-split path; by default the weights are kept VMEM-resident whenever
        they fit (this also minimizes k steps, important on v5e's single vst slot).
    Dropout is inference-mode (identity).  Returns (B, S, d_model) in x.dtype.
    """
    B, S, d_model = x.shape
    hidden = w1.shape[1]
    M = B * S
    out_dtype = x.dtype

    # Weights optionally cast host-side (small / reused); x is cast in-kernel so
    # activation HBM traffic stays a single read of the original dtype.
    if compute_dtype is not None:
        w1 = w1.astype(compute_dtype)
        w2 = w2.astype(compute_dtype)
    b1_2d = b1.astype(jnp.float32).reshape(1, hidden)
    b2_2d = b2.astype(jnp.float32).reshape(1, d_model)

    in_bytes = jnp.dtype(x.dtype).itemsize
    w_bytes = jnp.dtype(w1.dtype).itemsize
    out_bytes = jnp.dtype(out_dtype).itemsize
    sub = max(8, 32 // in_bytes)          # sublane pack of the x-tile dtype

    budget = _vmem_budget_bytes()

    # ---- fused fast-path feasibility: both weight matrices VMEM-resident -----
    # (weights budgeted as if double-buffered, so the sizing stays safe even if
    #  the Buffered(1) request below is unavailable; biases are tiny.)
    fixed_fast = 2 * 2 * d_model * hidden * w_bytes + 2 * 4 * (hidden + d_model)
    per_row_fast = (2 * d_model * in_bytes      # x tile (double-buffered)
                    + 2 * d_model * out_bytes   # out tile (double-buffered)
                    + hidden * 4                # f32 ReLU intermediate
                    + d_model * 4)              # f32 fc2 result before cast
    fast_rows = (budget - fixed_fast) // per_row_fast

    force_split = (block_k is not None and block_k < hidden
                   and hidden % block_k == 0 and block_k % 128 == 0)
    use_fast = (not force_split) and fast_rows >= min(M, sub)

    hidden_eff = hidden
    if use_fast:
        TK = hidden
        grid_k = 1
        tm_cap = min(block_m, max(sub, int(fast_rows)))
        TM = _choose_tm(M, tm_cap, sub)
    else:
        # ---- k-split path: tile the hidden dim (weights re-streamed per M tile).
        if force_split:
            TK = block_k
        else:
            tm_ref = min(_round_up(min(M, 256), sub), 256)
            row_fixed = tm_ref * (2 * d_model * in_bytes
                                  + 2 * d_model * out_bytes + d_model * 4)
            denom = 4 * d_model * w_bytes + tm_ref * 4
            tk_cap = max(128, (budget - row_fixed) // denom)
            TK = _largest_aligned_divisor(hidden, 128, tk_cap)
            if TK == 0:
                # No suitable multiple-of-128 divisor: zero-pad the hidden dim.
                # Exact: relu(0 + 0) = 0 times zero rows of w2 contributes nothing.
                hidden_eff = _round_up(hidden, 128)
                TK = _largest_aligned_divisor(hidden_eff, 128, tk_cap) or 128
        if hidden_eff != hidden:
            w1 = jnp.pad(w1, ((0, 0), (0, hidden_eff - hidden)))
            b1_2d = jnp.pad(b1_2d, ((0, 0), (0, hidden_eff - hidden)))
            w2 = jnp.pad(w2, ((0, hidden_eff - hidden), (0, 0)))
        grid_k = hidden_eff // TK
        fixed_split = 2 * 2 * d_model * TK * w_bytes + 2 * 4 * (TK + d_model)
        per_row_split = (2 * d_model * in_bytes + 2 * d_model * out_bytes
                         + d_model * 4            # f32 accumulator scratch
                         + TK * 4)                # f32 ReLU intermediate
        split_rows = max(sub, (budget - fixed_split) // per_row_split)
        TM = _choose_tm(M, min(block_m, int(split_rows)), sub)

    # ---- M tiling / (rare) padding of the ragged last tile --------------------
    x2d = x.reshape(M, d_model)
    Mp = _round_up(M, TM)
    if Mp != M:
        # TODO(synk): mask the ragged last tile in-kernel to avoid this copy.
        x2d = jnp.pad(x2d, ((0, Mp - M), (0, 0)))
    grid_m = Mp // TM

    # Advisory cost (includes weight re-streaming in the k-split regime).
    w_streams = grid_m if grid_k > 1 else 1
    cost = pl.CostEstimate(
        flops=4 * Mp * d_model * hidden_eff,
        transcendentals=0,
        bytes_accessed=(Mp * d_model * (in_bytes + out_bytes)
                        + w_streams * 2 * d_model * hidden_eff * w_bytes
                        + 4 * (hidden_eff + d_model)),
    )
    vmem_limit = int(budget)

    if use_fast:
        def call(resident_mode):
            w_kw = {} if resident_mode is None else {"pipeline_mode": resident_mode}
            return pl.pallas_call(
                _ffn_fused_kernel,
                out_shape=jax.ShapeDtypeStruct((Mp, d_model), out_dtype),
                grid=(grid_m,),
                in_specs=[
                    pl.BlockSpec((TM, d_model), lambda i: (i, 0)),           # x tile
                    pl.BlockSpec((d_model, hidden), lambda i: (0, 0), **w_kw),  # w1
                    pl.BlockSpec((1, hidden), lambda i: (0, 0), **w_kw),        # b1
                    pl.BlockSpec((hidden, d_model), lambda i: (0, 0), **w_kw),  # w2
                    pl.BlockSpec((1, d_model), lambda i: (0, 0), **w_kw),       # b2
                ],
                out_specs=pl.BlockSpec((TM, d_model), lambda i: (i, 0)),
                compiler_params=pltpu.CompilerParams(
                    dimension_semantics=("parallel",),
                    vmem_limit_bytes=vmem_limit),
                cost_estimate=cost,
            )(x2d, w1, b1_2d, w2, b2_2d)

        try:
            # Weights/biases have constant index maps (DMA'd once); single-buffer
            # them so the reclaimed VMEM is free for compiler scratch.
            out2d = call(pl.Buffered(1))
        except Exception:
            out2d = call(None)
    else:
        out2d = pl.pallas_call(
            _ffn_ksplit_kernel,
            out_shape=jax.ShapeDtypeStruct((Mp, d_model), out_dtype),
            grid=(grid_m, grid_k),
            in_specs=[
                pl.BlockSpec((TM, d_model), lambda i, k: (i, 0)),   # x row tile
                pl.BlockSpec((d_model, TK), lambda i, k: (0, k)),   # w1 hidden chunk
                pl.BlockSpec((1, TK), lambda i, k: (0, k)),         # b1 hidden chunk
                pl.BlockSpec((TK, d_model), lambda i, k: (k, 0)),   # w2 hidden chunk
                pl.BlockSpec((1, d_model), lambda i, k: (0, 0)),    # b2
            ],
            out_specs=pl.BlockSpec((TM, d_model), lambda i, k: (i, 0)),
            scratch_shapes=[pltpu.VMEM((TM, d_model), jnp.float32)],
            compiler_params=pltpu.CompilerParams(
                dimension_semantics=("parallel", "arbitrary"),
                vmem_limit_bytes=vmem_limit),
            cost_estimate=cost,
        )(x2d, w1, b1_2d, w2, b2_2d)

    return out2d[:M].reshape(B, S, d_model)


def _ref_forward(x, w1, b1, w2, b2):
    h = jnp.maximum(jnp.einsum("bsd,dh->bsh", x, w1) + b1, 0.0)
    return jnp.einsum("bsh,hd->bsd", h, w2) + b2


if __name__ == "__main__":
    key = jax.random.PRNGKey(0)

    # --- shape set 1: tiny FFN, exercises the fused (weights-resident) path ---
    B, S, d_model, hidden = 2, 8, 32, 64
    kx, kw1, kb1, kw2, kb2, k2 = jax.random.split(key, 6)
    x = jax.random.normal(kx, (B, S, d_model), dtype=jnp.float32)
    bound1 = 1.0 / (d_model ** 0.5)
    bound2 = 1.0 / (hidden ** 0.5)
    w1 = jax.random.uniform(kw1, (d_model, hidden), jnp.float32, -bound1, bound1)
    b1 = jax.random.uniform(kb1, (hidden,), jnp.float32, -bound1, bound1)
    w2 = jax.random.uniform(kw2, (hidden, d_model), jnp.float32, -bound2, bound2)
    b2 = jax.random.uniform(kb2, (d_model,), jnp.float32, -bound2, bound2)
    ref = _ref_forward(x, w1, b1, w2, b2)

    out = jax.block_until_ready(positionwise_forward(x, w1, b1, w2, b2))
    assert out.shape == (B, S, d_model)
    assert jnp.allclose(out, ref, atol=1e-4, rtol=1e-4)

    # Multi-row-tile grid (grid_m = 2) on the fused path.
    out_mt = jax.block_until_ready(
        positionwise_forward(x, w1, b1, w2, b2, block_m=8))
    assert jnp.allclose(out_mt, ref, atol=1e-4, rtol=1e-4)

    # bf16 MXU operands with f32 accumulation (full-rate MXU path).
    out_bf16 = jax.block_until_ready(
        positionwise_forward(x, w1, b1, w2, b2, compute_dtype=jnp.bfloat16))
    assert jnp.allclose(out_bf16, ref, atol=5e-2, rtol=5e-2)

    # --- shape set 2: hidden-split path (grid_k = 2) with f32 accumulator -----
    B2, S2, d_model2, hidden2 = 2, 16, 64, 256
    kx2, kw12, kb12, kw22, kb22 = jax.random.split(k2, 5)
    x2 = jax.random.normal(kx2, (B2, S2, d_model2), dtype=jnp.float32)
    c1 = 1.0 / (d_model2 ** 0.5)
    c2 = 1.0 / (hidden2 ** 0.5)
    w12 = jax.random.uniform(kw12, (d_model2, hidden2), jnp.float32, -c1, c1)
    b12 = jax.random.uniform(kb12, (hidden2,), jnp.float32, -c1, c1)
    w22 = jax.random.uniform(kw22, (hidden2, d_model2), jnp.float32, -c2, c2)
    b22 = jax.random.uniform(kb22, (d_model2,), jnp.float32, -c2, c2)
    ref2 = _ref_forward(x2, w12, b12, w22, b22)
    out2 = jax.block_until_ready(
        positionwise_forward(x2, w12, b12, w22, b22, block_m=16, block_k=128))
    assert jnp.allclose(out2, ref2, atol=1e-4, rtol=1e-4)

    print("KERNEL_OK")
</pallas_src>

<mosaic_0001>
module attributes {stable_mosaic.version = 11 : i64} {
  func.func @_ffn_fused_kernel(%arg0: i32, %arg1: memref<16x32xf32, #tpu.memory_space<vmem>>, %arg2: memref<32x64xf32, #tpu.memory_space<vmem>>, %arg3: memref<1x64xf32, #tpu.memory_space<vmem>>, %arg4: memref<64x32xf32, #tpu.memory_space<vmem>>, %arg5: memref<1x32xf32, #tpu.memory_space<vmem>>, %arg6: memref<16x32xf32, #tpu.memory_space<vmem>>) attributes {dimension_semantics = [#tpu.dimension_semantics<parallel>], iteration_bounds = array<i64: 1>, scalar_prefetch = 0 : i64, scratch_operands = 0 : i64, tpu.core_type = #tpu.core_type<tc>, window_params = [{transform_indices = @transform_0, window_bounds = array<i64: 16, 32>}, {pipeline_mode = #tpu.pipeline_mode<synchronous>, transform_indices = @transform_1, window_bounds = array<i64: 32, 64>}, {pipeline_mode = #tpu.pipeline_mode<synchronous>, transform_indices = @transform_2, window_bounds = array<i64: 1, 64>}, {pipeline_mode = #tpu.pipeline_mode<synchronous>, transform_indices = @transform_3, window_bounds = array<i64: 64, 32>}, {pipeline_mode = #tpu.pipeline_mode<synchronous>, transform_indices = @transform_4, window_bounds = array<i64: 1, 32>}, {transform_indices = @transform_5, window_bounds = array<i64: 16, 32>}]} {
    %c0 = arith.constant 0 : index
    %c0_0 = arith.constant 0 : index
    %0 = vector.load %arg1[%c0, %c0_0] : memref<16x32xf32, #tpu.memory_space<vmem>>, vector<16x32xf32>
    %c0_1 = arith.constant 0 : index
    %c0_2 = arith.constant 0 : index
    %1 = vector.load %arg2[%c0_1, %c0_2] : memref<32x64xf32, #tpu.memory_space<vmem>>, vector<32x64xf32>
    %cst = arith.constant dense<0.000000e+00> : vector<16x64xf32>
    %2 = tpu.matmul %0, %1, %cst {dimension_numbers = #tpu.dot_dimension_numbers<[1], [0], [0], [1], [0, 0, 1, 1], [], []>} : vector<16x32xf32>, vector<32x64xf32>, vector<16x64xf32> -> vector<16x64xf32>
    %c0_3 = arith.constant 0 : index
    %c0_4 = arith.constant 0 : index
    %3 = vector.load %arg3[%c0_3, %c0_4] : memref<1x64xf32, #tpu.memory_space<vmem>>, vector<1x64xf32>
    %4 = vector.broadcast %3 : vector<1x64xf32> to vector<16x64xf32>
    %5 = arith.addf %2, %4 : vector<16x64xf32>
    %cst_5 = arith.constant 0.000000e+00 : f32
    %6 = vector.broadcast %cst_5 : f32 to vector<16x64xf32>
    %7 = arith.maximumf %5, %6 : vector<16x64xf32>
    %c0_6 = arith.constant 0 : index
    %c0_7 = arith.constant 0 : index
    %8 = vector.load %arg4[%c0_6, %c0_7] : memref<64x32xf32, #tpu.memory_space<vmem>>, vector<64x32xf32>
    %cst_8 = arith.constant dense<0.000000e+00> : vector<16x32xf32>
    %9 = tpu.matmul %7, %8, %cst_8 {dimension_numbers = #tpu.dot_dimension_numbers<[1], [0], [0], [1], [0, 0, 1, 1], [], []>} : vector<16x64xf32>, vector<64x32xf32>, vector<16x32xf32> -> vector<16x32xf32>
    %c0_9 = arith.constant 0 : index
    %c0_10 = arith.constant 0 : index
    %10 = vector.load %arg5[%c0_9, %c0_10] : memref<1x32xf32, #tpu.memory_space<vmem>>, vector<1x32xf32>
    %11 = vector.broadcast %10 : vector<1x32xf32> to vector<16x32xf32>
    %12 = arith.addf %9, %11 : vector<16x32xf32>
    %c0_11 = arith.constant 0 : index
    %c0_12 = arith.constant 0 : index
    %13 = vector.load %arg6[%c0_11, %c0_12] : memref<16x32xf32, #tpu.memory_space<vmem>>, vector<16x32xf32>
    tpu.vector_store %arg6[%c0_11, %c0_12], %12 {strides = array<i32>} : memref<16x32xf32, #tpu.memory_space<vmem>>, vector<16x32xf32>,
    return
  }
  func.func @transform_0(%arg0: i32) -> (i32, i32) {
    %c0_i32 = arith.constant 0 : i32
    %c0_i32_0 = arith.constant 0 : i32
    return %arg0, %c0_i32 : i32, i32
  }
  func.func @transform_1(%arg0: i32) -> (i32, i32) {
    %c0_i32 = arith.constant 0 : i32
    %c0_i32_0 = arith.constant 0 : i32
    %c0_i32_1 = arith.constant 0 : i32
    return %c0_i32, %c0_i32_0 : i32, i32
  }
  func.func @transform_2(%arg0: i32) -> (i32, i32) {
    %c0_i32 = arith.constant 0 : i32
    %c0_i32_0 = arith.constant 0 : i32
    %c0_i32_1 = arith.constant 0 : i32
    return %c0_i32, %c0_i32_0 : i32, i32
  }
  func.func @transform_3(%arg0: i32) -> (i32, i32) {
    %c0_i32 = arith.constant 0 : i32
    %c0_i32_0 = arith.constant 0 : i32
    %c0_i32_1 = arith.constant 0 : i32
    return %c0_i32, %c0_i32_0 : i32, i32
  }
  func.func @transform_4(%arg0: i32) -> (i32, i32) {
    %c0_i32 = arith.constant 0 : i32
    %c0_i32_0 = arith.constant 0 : i32
    %c0_i32_1 = arith.constant 0 : i32
    return %c0_i32, %c0_i32_0 : i32, i32
  }
  func.func @transform_5(%arg0: i32) -> (i32, i32) {
    %c0_i32 = arith.constant 0 : i32
    %c0_i32_0 = arith.constant 0 : i32
    return %arg0, %c0_i32 : i32, i32
  }
}

module attributes {stable_mosaic.version = 11 : i64} {
  func.func @_ffn_fused_kernel(%arg0: i32, %arg1: memref<16x32xf32, #tpu.memory_space<vmem>>, %arg2: memref<32x64xf32, #tpu.memory_space<vmem>>, %arg3: memref<1x64xf32, #tpu.memory_space<vmem>>, %arg4: memref<64x32xf32, #tpu.memory_space<vmem>>, %arg5: memref<1x32xf32, #tpu.memory_space<vmem>>, %arg6: memref<16x32xf32, #tpu.memory_space<vmem>>) attributes {dimension_semantics = [#tpu.dimension_semantics<parallel>], iteration_bounds = array<i64: 1>, scalar_prefetch = 0 : i64, scratch_operands = 0 : i64, tpu.core_type = #tpu.core_type<tc>, window_params = [{transform_indices = @transform_0, window_bounds = array<i64: 16, 32>}, {pipeline_mode = #tpu.pipeline_mode<synchronous>, transform_indices = @transform_1, window_bounds = array<i64: 32, 64>}, {pipeline_mode = #tpu.pipeline_mode<synchronous>, transform_indices = @transform_2, window_bounds = array<i64: 1, 64>}, {pipeline_mode = #tpu.pipeline_mode<synchronous>, transform_indices = @transform_3, window_bounds = array<i64: 64, 32>}, {pipeline_mode = #tpu.pipeline_mode<synchronous>, transform_indices = @transform_4, window_bounds = array<i64: 1, 32>}, {transform_indices = @transform_5, window_bounds = array<i64: 16, 32>}]} {
    %c0 = arith.constant 0 : index
    %c0_0 = arith.constant 0 : index
    %0 = vector.load %arg1[%c0, %c0_0] : memref<16x32xf32, #tpu.memory_space<vmem>>, vector<16x32xf32>
    %c0_1 = arith.constant 0 : index
    %c0_2 = arith.constant 0 : index
    %1 = vector.load %arg2[%c0_1, %c0_2] : memref<32x64xf32, #tpu.memory_space<vmem>>, vector<32x64xf32>
    %cst = arith.constant dense<0.000000e+00> : vector<16x64xf32>
    %2 = tpu.matmul %0, %1, %cst {dimension_numbers = #tpu.dot_dimension_numbers<[1], [0], [0], [1], [0, 0, 1, 1], [], []>} : vector<16x32xf32>, vector<32x64xf32>, vector<16x64xf32> -> vector<16x64xf32>
    %c0_3 = arith.constant 0 : index
    %c0_4 = arith.constant 0 : index
    %3 = vector.load %arg3[%c0_3, %c0_4] : memref<1x64xf32, #tpu.memory_space<vmem>>, vector<1x64xf32>
    %4 = vector.broadcast %3 : vector<1x64xf32> to vector<16x64xf32>
    %5 = arith.addf %2, %4 : vector<16x64xf32>
    %cst_5 = arith.constant 0.000000e+00 : f32
    %6 = vector.broadcast %cst_5 : f32 to vector<16x64xf32>
    %7 = arith.maximumf %5, %6 : vector<16x64xf32>
    %c0_6 = arith.constant 0 : index
    %c0_7 = arith.constant 0 : index
    %8 = vector.load %arg4[%c0_6, %c0_7] : memref<64x32xf32, #tpu.memory_space<vmem>>, vector<64x32xf32>
    %cst_8 = arith.constant dense<0.000000e+00> : vector<16x32xf32>
    %9 = tpu.matmul %7, %8, %cst_8 {dimension_numbers = #tpu.dot_dimension_numbers<[1], [0], [0], [1], [0, 0, 1, 1], [], []>} : vector<16x64xf32>, vector<64x32xf32>, vector<16x32xf32> -> vector<16x32xf32>
    %c0_9 = arith.constant 0 : index
    %c0_10 = arith.constant 0 : index
    %10 = vector.load %arg5[%c0_9, %c0_10] : memref<1x32xf32, #tpu.memory_space<vmem>>, vector<1x32xf32>
    %11 = vector.broadcast %10 : vector<1x32xf32> to vector<16x32xf32>
    %12 = arith.addf %9, %11 : vector<16x32xf32>
    %c0_11 = arith.constant 0 : index
    %c0_12 = arith.constant 0 : index
    %13 = vector.load %arg6[%c0_11, %c0_12] : memref<16x32xf32, #tpu.memory_space<vmem>>, vector<16x32xf32>
    tpu.vector_store %arg6[%c0_11, %c0_12], %12 {strides = array<i32>} : memref<16x32xf32, #tpu.memory_space<vmem>>, vector<16x32xf32>,
    return
  }
  func.func @transform_0(%arg0: i32) -> (i32, i32) {
    %c0_i32 = arith.constant 0 : i32
    %c0_i32_0 = arith.constant 0 : i32
    return %arg0, %c0_i32 : i32, i32
  }
  func.func @transform_1(%arg0: i32) -> (i32, i32) {
    %c0_i32 = arith.constant 0 : i32
    %c0_i32_0 = arith.constant 0 : i32
    %c0_i32_1 = arith.constant 0 : i32
    return %c0_i32, %c0_i32_0 : i32, i32
  }
  func.func @transform_2(%arg0: i32) -> (i32, i32) {
    %c0_i32 = arith.constant 0 : i32
    %c0_i32_0 = arith.constant 0 : i32
    %c0_i32_1 = arith.constant 0 : i32
    return %c0_i32, %c0_i32_0 : i32, i32
  }
  func.func @transform_3(%arg0: i32) -> (i32, i32) {
    %c0_i32 = arith.constant 0 : i32
    %c0_i32_0 = arith.constant 0 : i32
    %c0_i32_1 = arith.constant 0 : i32
    return %c0_i32, %c0_i32_0 : i32, i32
  }
  func.func @transform_4(%arg0: i32) -> (i32, i32) {
    %c0_i32 = arith.constant 0 : i32
    %c0_i32_0 = arith.constant 0 : i32
    %c0_i32_1 = arith.constant 0 : i32
    return %c0_i32, %c0_i32_0 : i32, i32
  }
  func.func @transform_5(%arg0: i32) -> (i32, i32) {
    %c0_i32 = arith.constant 0 : i32
    %c0_i32_0 = arith.constant 0 : i32
    return %arg0, %c0_i32 : i32, i32
  }
}

</mosaic_0001>

<bundles_post_ra>
// kernel: tpu_custom_call.1
= control target key start
LH: loop header
LB: loop body
LE: loop exit
PB: predicated region body
PF: predicated region fallthrough
CT: control target
= control target key end

     0   :  { %vm34_vm0 = vcmask 261120   ;;  %s398_s0 = inlined_call_operand.vmem [shape: f32[16,32], index: 0, kind: input, shape index: {}]   ;;  %s399_s1 = inlined_call_operand.vmem [shape: f32[32,64], index: 1, kind: input, shape index: {}]   ;;  %s400_s2 = inlined_call_operand.vmem [shape: f32[1,64], index: 2, kind: input, shape index: {}]   ;;  %s401_s3 = inlined_call_operand.vmem [shape: f32[64,32], index: 3, kind: input, shape index: {}]   ;;  %s402_s4 = inlined_call_operand.vmem [shape: f32[1,32], index: 4, kind: input, shape index: {}]   ;;  %s403_s5 = inlined_call_operand.hbm [shape: f32[16,32], index: 5, kind: output, shape index: {}]  }
   0x1   :  { %v26_v0 = vld [vmem:[%s399_s1 + $0x18] sm:$0xff]  ;;  %v25_v1 = vld [vmem:[%s399_s1 + $0x10] sm:$0xff]  ;;  %v21_v2 = vld [vmem:[%s398_s0] sm:$0xff] }
   0x2   :  { %255 = vmatprep.subr.mxu0 %v26_v0  ;;  %v24_v3 = vld [vmem:[%s399_s1 + $0x8] sm:$0xff]  ;;  %263 = vmatprep.mubr.msk.f32.mxu0 %vm34_vm0, %v21_v2  ;;  %v125_v4 = vld [vmem:[%s401_s3 + $0x38] sm:$0xff]  ;;  %v124_v5 = vld [vmem:[%s401_s3 + $0x30] sm:$0xff] }
   0x3   :  { %256 = vmatpush3.msra.mxu0 %v26_v0  ;;  %266 = vmatprep.subr.mxu1 %v125_v4 }
   0x4   :  { %257 = vmatprep.subr.mxu0 %v25_v1 }
   0x5   :  { %10 = vsyncpa [#allocation3], 0  ;;  %258 = vmatpush3.msra.mxu0 %v25_v1  ;;  %v23_v6 = vld [vmem:[%s399_s1] sm:$0xff]  ;;  %267 = vmatpush3.msra.mxu1 %v125_v4  ;;  %v123_v7 = vld [vmem:[%s401_s3 + $0x28] sm:$0xff]  ;;  %vm133_vm1 = vcmask 523264  }
   0x6   :  { %259 = vmatprep.subr.mxu0 %v24_v3  ;;  %268 = vmatprep.subr.mxu1 %v124_v5  ;;  %v22_v8 = vld [vmem:[%s398_s0 + $0x8] sm:$0xff]  ;;  %v122_v9 = vld [vmem:[%s401_s3 + $0x20] sm:$0xff]  ;;  %v121_v10 = vld [vmem:[%s401_s3 + $0x18] sm:$0xff] }
   0x7   :  { %260 = vmatpush3.msra.mxu0 %v24_v3  ;;  %269 = vmatpush3.msra.mxu1 %v124_v5  ;;  %v120_v11 = vld [vmem:[%s401_s3 + $0x10] sm:$0xff]  ;;  %v119_v12 = vld [vmem:[%s401_s3 + $0x8] sm:$0xff]  ;;  %v118_v13 = vld [vmem:[%s401_s3] sm:$0xff]  ;;  %s310_s3 = smov [#allocation2]  }
   0x8   :  { %261 = vmatprep.subr.mxu0 %v23_v6  ;;  %270 = vmatprep.subr.mxu1 %v123_v7  ;;  %v233_v14 = vld [vmem:[%s400_s2] ss:$0 sm:$0xff]  ;;  %s222_s23 = sshll.u32 %s310_s3, 4  ;;  %s223_s23 = int_to_ptr.vmem [resolvable:$true] %s222_s23 }
   0x9   :  { %262 = vmatpush3.msra.mxu0 %v23_v6  ;;  %271 = vmatpush3.msra.mxu1 %v123_v7  ;;  %v236_v21 = vld [vmem:[%s402_s4] ss:$0 sm:$0xff]  ;;  %s288_s2 = scalar_lea.vmem %s223_s23, 256  ;;  %p293_p1 = scmp.lt.s32.totalorder %s223_s23, %s223_s23 }
   0xa   :  { %264 = vmatmul.mubr.msk.f32.vlgmr.msra.gmra.mxu0 %vm34_vm0, %v22_v8  ;;  %272 = vmatprep.subr.mxu1 %v122_v9  ;;  %p289_p0 = scmp.ne.s32.totalorder %s223_s23, %s288_s2  ;;  %p294_p2 = scmp.lt.s32.totalorder %s288_s2, %s288_s2 }
   0xb   :  { %273 = vmatpush3.msra.mxu1 %v122_v9 }
   0xc   :  { %274 = vmatprep.subr.mxu1 %v121_v10  ;;  %p295_p3 = por %p294_p2, %p293_p1 }
   0xd   :  { %275 = vmatpush3.msra.mxu1 %v121_v10 }
   0xe   :  { %276 = vmatprep.subr.mxu1 %v120_v11  ;;  %p296_p4 = pnand %p295_p3, %p289_p0 }
   0xf   :  { %277 = vmatpush3.msra.mxu1 %v120_v11 }
  0x10   :  { %278 = vmatprep.subr.mxu1 %v119_v12 }
  0x11   :  { %279 = vmatpush3.msra.mxu1 %v119_v12 }
  0x12   :  { %280 = vmatprep.subr.mxu1 %v118_v13 }
  0x13   :  { %281 = vmatpush3.msra.mxu1 %v118_v13 }
  0xca   :  { %v265_v15 = vpop.f32.mrf.mxu0 }
  0xcb   :  { %v113_v16 = vadd.f32 %v265_v15, %v233_v14 }
  0xcc   :  { %v107_v17 = vpop.f32.mrf.mxu0 }
  0xcd   :  { %v108_v18 = vadd.f32 %v233_v14, %v107_v17  ;;  %v117_v20 = vmax.f32 %v113_v16, 0.0 }
  0xcf   :  { %v116_v19 = vmax.f32 %v108_v18, 0.0 }
  0xd1   :  { %282 = vmatprep.mubr.msk.f32.mxu1 %vm133_vm1, %v116_v19 }
  0xd2   :  { %283 = vmatmul.mubr.msk.f32.vlgmr.msra.gmra.mxu1 %vm133_vm1, %v117_v20 }
 0x192   :  { %v284_v22 = vpop.f32.mrf.mxu1 }
 0x193   :  { %v212_v23 = vadd.f32 %v284_v22, %v236_v21 }
 0x194   :  { %v206_v24 = vpop.f32.mrf.mxu1 }
 0x195   :  { %216 = vst.msk [vmem:[#allocation2 + $0x8] sm:$0xff] %vm34_vm0, %v212_v23  ;;  %v207_v25 = vadd.f32 %v236_v21, %v206_v24 }
 0x197   :  { %215 = vst.msk [vmem:[#allocation2] sm:$0xff] %vm34_vm0, %v207_v25 }
 0x198   :  { %299 = shalt.err (!%p296_p4)
}
 0x199   :  { %s311_s24 = smov 128   ;;  %s312_s4 = smov 8  }
 0x19a   :  { %228 = dma.vmem_to_hbm [thread:$0]  %s223_s23, 256, %s403_s5, [#allocation3], %s311_s24, %s311_s24, %s312_s4  }
 0x19b   :  { %308 = dma.done.wait [#allocation3], 256  }
 0x19c   :  { %309 = vsyncadd [#allocation3], 4294967040 }
 0x19d   :  { %232 = vsyncpa [#allocation3], 1 }

// kernel: tpu_custom_call.1
= control target key start
LH: loop header
LB: loop body
LE: loop exit
PB: predicated region body
PF: predicated region fallthrough
CT: control target
= control target key end

     0   :  { %vm34_vm0 = vcmask 261120   ;;  %s398_s0 = inlined_call_operand.vmem [shape: f32[16,32], index: 0, kind: input, shape index: {}]   ;;  %s399_s1 = inlined_call_operand.vmem [shape: f32[32,64], index: 1, kind: input, shape index: {}]   ;;  %s400_s2 = inlined_call_operand.vmem [shape: f32[1,64], index: 2, kind: input, shape index: {}]   ;;  %s401_s3 = inlined_call_operand.vmem [shape: f32[64,32], index: 3, kind: input, shape index: {}]   ;;  %s402_s4 = inlined_call_operand.vmem [shape: f32[1,32], index: 4, kind: input, shape index: {}]   ;;  %s403_s5 = inlined_call_operand.hbm [shape: f32[16,32], index: 5, kind: output, shape index: {}]  }
   0x1   :  { %v26_v0 = vld [vmem:[%s399_s1 + $0x18] sm:$0xff]  ;;  %v25_v1 = vld [vmem:[%s399_s1 + $0x10] sm:$0xff]  ;;  %v21_v2 = vld [vmem:[%s398_s0] sm:$0xff] }
   0x2   :  { %255 = vmatprep.subr.mxu0 %v26_v0  ;;  %v24_v3 = vld [vmem:[%s399_s1 + $0x8] sm:$0xff]  ;;  %263 = vmatprep.mubr.msk.f32.mxu0 %vm34_vm0, %v21_v2  ;;  %v125_v4 = vld [vmem:[%s401_s3 + $0x38] sm:$0xff]  ;;  %v124_v5 = vld [vmem:[%s401_s3 + $0x30] sm:$0xff] }
   0x3   :  { %256 = vmatpush3.msra.mxu0 %v26_v0  ;;  %266 = vmatprep.subr.mxu1 %v125_v4 }
   0x4   :  { %257 = vmatprep.subr.mxu0 %v25_v1 }
   0x5   :  { %10 = vsyncpa [#allocation3], 0  ;;  %258 = vmatpush3.msra.mxu0 %v25_v1  ;;  %v23_v6 = vld [vmem:[%s399_s1] sm:$0xff]  ;;  %267 = vmatpush3.msra.mxu1 %v125_v4  ;;  %v123_v7 = vld [vmem:[%s401_s3 + $0x28] sm:$0xff]  ;;  %vm133_vm1 = vcmask 523264  }
   0x6   :  { %259 = vmatprep.subr.mxu0 %v24_v3  ;;  %268 = vmatprep.subr.mxu1 %v124_v5  ;;  %v22_v8 = vld [vmem:[%s398_s0 + $0x8] sm:$0xff]  ;;  %v122_v9 = vld [vmem:[%s401_s3 + $0x20] sm:$0xff]  ;;  %v121_v10 = vld [vmem:[%s401_s3 + $0x18] sm:$0xff] }
   0x7   :  { %260 = vmatpush3.msra.mxu0 %v24_v3  ;;  %269 = vmatpush3.msra.mxu1 %v124_v5  ;;  %v120_v11 = vld [vmem:[%s401_s3 + $0x10] sm:$0xff]  ;;  %v119_v12 = vld [vmem:[%s401_s3 + $0x8] sm:$0xff]  ;;  %v118_v13 = vld [vmem:[%s401_s3] sm:$0xff]  ;;  %s310_s3 = smov [#allocation2]  }
   0x8   :  { %261 = vmatprep.subr.mxu0 %v23_v6  ;;  %270 = vmatprep.subr.mxu1 %v123_v7  ;;  %v233_v14 = vld [vmem:[%s400_s2] ss:$0 sm:$0xff]  ;;  %s222_s23 = sshll.u32 %s310_s3, 4  ;;  %s223_s23 = int_to_ptr.vmem [resolvable:$true] %s222_s23 }
   0x9   :  { %262 = vmatpush3.msra.mxu0 %v23_v6  ;;  %271 = vmatpush3.msra.mxu1 %v123_v7  ;;  %v236_v21 = vld [vmem:[%s402_s4] ss:$0 sm:$0xff]  ;;  %s288_s2 = scalar_lea.vmem %s223_s23, 256  ;;  %p293_p1 = scmp.lt.s32.totalorder %s223_s23, %s223_s23 }
   0xa   :  { %264 = vmatmul.mubr.msk.f32.vlgmr.msra.gmra.mxu0 %vm34_vm0, %v22_v8  ;;  %272 = vmatprep.subr.mxu1 %v122_v9  ;;  %p289_p0 = scmp.ne.s32.totalorder %s223_s23, %s288_s2  ;;  %p294_p2 = scmp.lt.s32.totalorder %s288_s2, %s288_s2 }
   0xb   :  { %273 = vmatpush3.msra.mxu1 %v122_v9 }
   0xc   :  { %274 = vmatprep.subr.mxu1 %v121_v10  ;;  %p295_p3 = por %p294_p2, %p293_p1 }
   0xd   :  { %275 = vmatpush3.msra.mxu1 %v121_v10 }
   0xe   :  { %276 = vmatprep.subr.mxu1 %v120_v11  ;;  %p296_p4 = pnand %p295_p3, %p289_p0 }
   0xf   :  { %277 = vmatpush3.msra.mxu1 %v120_v11 }
  0x10   :  { %278 = vmatprep.subr.mxu1 %v119_v12 }
  0x11   :  { %279 = vmatpush3.msra.mxu1 %v119_v12 }
  0x12   :  { %280 = vmatprep.subr.mxu1 %v118_v13 }
  0x13   :  { %281 = vmatpush3.msra.mxu1 %v118_v13 }
  0xca   :  { %v265_v15 = vpop.f32.mrf.mxu0 }
  0xcb   :  { %v113_v16 = vadd.f32 %v265_v15, %v233_v14 }
  0xcc   :  { %v107_v17 = vpop.f32.mrf.mxu0 }
  0xcd   :  { %v108_v18 = vadd.f32 %v233_v14, %v107_v17  ;;  %v117_v20 = vmax.f32 %v113_v16, 0.0 }
  0xcf   :  { %v116_v19 = vmax.f32 %v108_v18, 0.0 }
  0xd1   :  { %282 = vmatprep.mubr.msk.f32.mxu1 %vm133_vm1, %v116_v19 }
  0xd2   :  { %283 = vmatmul.mubr.msk.f32.vlgmr.msra.gmra.mxu1 %vm133_vm1, %v117_v20 }
 0x192   :  { %v284_v22 = vpop.f32.mrf.mxu1 }
 0x193   :  { %v212_v23 = vadd.f32 %v284_v22, %v236_v21 }
 0x194   :  { %v206_v24 = vpop.f32.mrf.mxu1 }
 0x195   :  { %216 = vst.msk [vmem:[#allocation2 + $0x8] sm:$0xff] %vm34_vm0, %v212_v23  ;;  %v207_v25 = vadd.f32 %v236_v21, %v206_v24 }
 0x197   :  { %215 = vst.msk [vmem:[#allocation2] sm:$0xff] %vm34_vm0, %v207_v25 }
 0x198   :  { %299 = shalt.err (!%p296_p4)
}
 0x199   :  { %s311_s24 = smov 128   ;;  %s312_s4 = smov 8  }
 0x19a   :  { %228 = dma.vmem_to_hbm [thread:$0]  %s223_s23, 256, %s403_s5, [#allocation3], %s311_s24, %s311_s24, %s312_s4  }
 0x19b   :  { %308 = dma.done.wait [#allocation3], 256  }
 0x19c   :  { %309 = vsyncadd [#allocation3], 4294967040 }
 0x19d   :  { %232 = vsyncpa [#allocation3], 1 }

</bundles_post_ra>
